<compile_context>
chip_gen: v7x
topology: tpu7x:2x2x1
jax: 0.10.0
libtpu: 0.0.40
codegen_flags: <defaults>
</compile_context>

<pallas_src>
import functools

import jax
import jax.numpy as jnp
from jax.experimental import pallas as pl
from jax.experimental.pallas import tpu as pltpu


# ---------------------------------------------------------------------------
# Kernel 1: batched input projection  gx = x @ W_ih + b   (lane-dense, 4H wide)
# ---------------------------------------------------------------------------
def _gate_proj_kernel(x_ref, wih_ref, b_ref, gx_ref):
    gx_ref[...] = (jnp.dot(x_ref[...], wih_ref[...],
                           preferred_element_type=jnp.float32)
                   + b_ref[...]).astype(gx_ref.dtype)


# ---------------------------------------------------------------------------
# Kernel 2: LSTM recurrence over time chunks (h/c carried in small VMEM scratch)
# ---------------------------------------------------------------------------
def _lstm_chunk_kernel(gx_ref, whh_ref, hid_ref, h_sc, c_sc, *, ts, bp, hidden):
    """One grid step = `ts` time steps of the recurrence for the whole padded batch.

    gx_ref:  (ts*bp, 4H) f32  precomputed input-projection pre-activations (bias folded in)
    whh_ref: (H, 4H)     bf16 fused recurrent weight (gate order i, f, g, o along lanes)
    hid_ref: (ts*bp, H)  bf16 hidden-state output rows for this chunk
    h_sc/c_sc: (bp, H)   f32  recurrent state, persists across grid steps
    """
    H = hidden

    @pl.when(pl.program_id(0) == 0)
    def _():
        h_sc[...] = jnp.zeros_like(h_sc)           # PyTorch default zero (h0, c0)
        c_sc[...] = jnp.zeros_like(c_sc)

    # A handful of vregs at H<=128.  For large H, index whh_ref inside `step` instead so
    # the MXU streams the weight from VMEM rather than forcing vreg spills.
    w_hh = whh_ref[...]                            # (H, 4H) bf16

    def step(t, carry):
        h, c = carry                               # (bp, H) f32, kept in vregs
        row0 = pl.multiple_of(t * bp, bp)          # sublane-aligned (bp % 8 == 0)
        # ONE MXU push per serial step: fused (bp,H) @ (H,4H) recurrent matmul.
        gates = gx_ref[pl.ds(row0, bp), :] + jnp.dot(
            h.astype(jnp.bfloat16), w_hh, preferred_element_type=jnp.float32)
        # Two lane-dense EUP passes over the whole (bp,4H) slab instead of five
        # lane-sparse per-gate ones; per-gate views are cheap lane slices.
        sig = jax.nn.sigmoid(gates)                # valid for i / f / o lanes
        th = jnp.tanh(gates)                       # valid for g lanes
        i_g = sig[:, 0 * H:1 * H]
        f_g = sig[:, 1 * H:2 * H]
        g_g = th[:, 2 * H:3 * H]
        o_g = sig[:, 3 * H:4 * H]
        c_new = f_g * c + i_g * g_g                # elementwise math stays f32 (v5e-friendly)
        h_new = o_g * jnp.tanh(c_new)
        hid_ref[pl.ds(row0, bp), :] = h_new.astype(hid_ref.dtype)
        return h_new, c_new

    h_f, c_f = jax.lax.fori_loop(0, ts, step, (h_sc[...], c_sc[...]),
                                 unroll=min(ts, 4))   # bounded unroll: keep vreg pressure low
    h_sc[...] = h_f
    c_sc[...] = c_f


# ---------------------------------------------------------------------------
# Kernel 3: vocab projection  logits = hiddens @ W_out + b_out  (row x vocab tiles)
# ---------------------------------------------------------------------------
def _vocab_proj_kernel(h_ref, w_ref, b_ref, o_ref):
    o_ref[...] = (jnp.dot(h_ref[...], w_ref[...],
                          preferred_element_type=jnp.float32)
                  + b_ref[...]).astype(o_ref.dtype)


# ---------------------------------------------------------------------------
# Wrapper
# ---------------------------------------------------------------------------
def _round_up(x, m):
    return ((x + m - 1) // m) * m


def _row_tile(n, cap=512, quantum=16):
    """Largest multiple-of-`quantum` divisor of n that is <= cap (fall back to full n)."""
    cap = min(cap, n)
    t = cap - cap % quantum
    while t >= quantum:
        if n % t == 0:
            return t
        t -= quantum
    return n


def _vocab_tile(vp):
    for t in (512, 256, 128):                      # 512/256 match the 256-wide v6e/v7x MXU
        if vp % t == 0:
            return t
    return vp                                      # unreachable: vp is a multiple of 128


def caption_generator_forward(features, captions, params):
    """features: (B, E) f32, captions: (B, T) int32 -> logits (B, T+1, V) f32."""
    emb_table = params["embedding"]     # (V, E)
    w_ih = params["w_ih"]               # (E, 4H)  (transposed PyTorch weight_ih_l0; gates i,f,g,o)
    w_hh = params["w_hh"]               # (H, 4H)  (transposed PyTorch weight_hh_l0)
    b = params["b"]                     # (1, 4H)  (b_ih + b_hh)
    w_out = params["w_out"]             # (H, V)   (transposed Linear weight)
    b_out = params["b_out"]             # (1, V)

    B, E = features.shape
    H = w_hh.shape[0]
    G = 4 * H
    V = w_out.shape[1]

    # glue: embedding gather + prepend the image feature as the first time step
    embeddings = jnp.take(emb_table, captions, axis=0)                    # (B, T, E)
    x = jnp.concatenate([features[:, None, :], embeddings], axis=1)       # (B, S, E)
    S = x.shape[1]

    # Padding: batch -> sublane multiple; time -> chunk multiple; vocab -> lane multiple.
    Bp = _round_up(max(B, 8), 8)
    TS = min(S, 16)                       # time steps per recurrence grid chunk
    Sp = _round_up(S, TS)
    Rp = Sp * Bp                          # padded time-major row count
    Vp = _round_up(V, 128)                # lane-dense vocab (128 valid on all chips)

    x_tm = jnp.transpose(x, (1, 0, 2)).astype(jnp.float32)                # (S, B, E)
    x_tm = jnp.pad(x_tm, ((0, Sp - S), (0, Bp - B), (0, 0)))              # (Sp, Bp, E)
    x2d = x_tm.reshape(Rp, E).astype(jnp.bfloat16)                        # matmul operand

    # bf16 matmul operands (f32 accumulation); biases stay f32.
    # TODO(synk): for bit-tight parity with fp32 PyTorch, drop the bf16 casts and use
    # precision=HIGHEST in the dots.
    w_ih_b = w_ih.astype(jnp.bfloat16)                                    # (E, 4H)
    w_hh_b = w_hh.astype(jnp.bfloat16)                                    # (H, 4H)
    b_f = b.astype(jnp.float32)                                           # (1, 4H)
    w_out_b = jnp.pad(w_out, ((0, 0), (0, Vp - V))).astype(jnp.bfloat16)  # (H, Vp)
    b_out_f = jnp.pad(b_out, ((0, 0), (0, Vp - V))).astype(jnp.float32)   # (1, Vp)

    # ---- kernel 1: pipelined, row-tiled input projection  gx = x @ W_ih + b ----
    TRa = _row_tile(Rp)
    gx = pl.pallas_call(
        _gate_proj_kernel,
        out_shape=jax.ShapeDtypeStruct((Rp, G), jnp.float32),
        grid_spec=pltpu.PrefetchScalarGridSpec(
            num_scalar_prefetch=0,
            grid=(Rp // TRa,),
            in_specs=[
                pl.BlockSpec((TRa, E), lambda i: (i, 0)),
                pl.BlockSpec((E, G), lambda i: (0, 0)),
                pl.BlockSpec((1, G), lambda i: (0, 0)),
            ],
            out_specs=pl.BlockSpec((TRa, G), lambda i: (i, 0)),
        ),
        compiler_params=pltpu.CompilerParams(
            dimension_semantics=("parallel",),
            vmem_limit_bytes=32 * 1024 * 1024),
    )(x2d, w_ih_b, b_f)

    # ---- kernel 2: LSTM recurrence, time-chunked through the grid ----
    # TODO(synk): on v7x the padded batch could be split across the 2 TensorCores
    # (leading grid axis over Bp/2); not done here (toy Bp=8 cannot split sublane-aligned).
    hiddens = pl.pallas_call(
        functools.partial(_lstm_chunk_kernel, ts=TS, bp=Bp, hidden=H),
        out_shape=jax.ShapeDtypeStruct((Rp, H), jnp.bfloat16),
        grid_spec=pltpu.PrefetchScalarGridSpec(
            num_scalar_prefetch=0,
            grid=(Sp // TS,),
            in_specs=[
                pl.BlockSpec((TS * Bp, G), lambda t: (t, 0)),   # gate slab for this time chunk
                pl.BlockSpec((H, G), lambda t: (0, 0)),         # fused W_hh (constant block)
            ],
            out_specs=pl.BlockSpec((TS * Bp, H), lambda t: (t, 0)),
            scratch_shapes=[pltpu.VMEM((Bp, H), jnp.float32),   # h state
                            pltpu.VMEM((Bp, H), jnp.float32)],  # c state
        ),
        compiler_params=pltpu.CompilerParams(
            dimension_semantics=("arbitrary",),                 # recurrence is sequential
            vmem_limit_bytes=32 * 1024 * 1024),
    )(gx, w_hh_b)

    # nn.Dropout(p=0.5) is identity at inference.
    # TODO(synk): training-mode dropout (pltpu.prng_random_bits mask) not implemented.

    # ---- kernel 3: vocab projection, tiled over rows x vocab, both "parallel" ----
    TR = _row_tile(Rp)
    TV = _vocab_tile(Vp)
    logits2d = pl.pallas_call(
        _vocab_proj_kernel,
        out_shape=jax.ShapeDtypeStruct((Rp, Vp), jnp.float32),
        grid_spec=pltpu.PrefetchScalarGridSpec(
            num_scalar_prefetch=0,
            grid=(Rp // TR, Vp // TV),
            in_specs=[
                pl.BlockSpec((TR, H), lambda i, j: (i, 0)),
                pl.BlockSpec((H, TV), lambda i, j: (0, j)),
                pl.BlockSpec((1, TV), lambda i, j: (0, j)),
            ],
            out_specs=pl.BlockSpec((TR, TV), lambda i, j: (i, j)),
        ),
        compiler_params=pltpu.CompilerParams(
            dimension_semantics=("parallel", "parallel"),
            vmem_limit_bytes=32 * 1024 * 1024),
    )(hiddens, w_out_b, b_out_f)

    # drop padded time/batch/vocab entries, back to batch-first
    logits = logits2d.reshape(Sp, Bp, Vp)[:S, :B, :V]             # (S, B, V)
    return jnp.transpose(logits, (1, 0, 2))                       # (B, S, V)


def _reference_forward(features, captions, params):
    """Pure-JAX f32 reference (matches PyTorch LSTM + Linear semantics, eval mode)."""
    emb = jnp.take(params["embedding"], captions, axis=0)
    x = jnp.concatenate([features[:, None, :], emb], axis=1)
    H = params["w_hh"].shape[0]
    B = features.shape[0]

    def step(carry, x_t):
        h, c = carry
        gates = x_t @ params["w_ih"] + h @ params["w_hh"] + params["b"]
        i = jax.nn.sigmoid(gates[:, 0 * H:1 * H])
        f = jax.nn.sigmoid(gates[:, 1 * H:2 * H])
        g = jnp.tanh(gates[:, 2 * H:3 * H])
        o = jax.nn.sigmoid(gates[:, 3 * H:4 * H])
        c = f * c + i * g
        h = o * jnp.tanh(c)
        return (h, c), h @ params["w_out"] + params["b_out"]

    init = (jnp.zeros((B, H), jnp.float32), jnp.zeros((B, H), jnp.float32))
    _, outs = jax.lax.scan(step, init, jnp.transpose(x, (1, 0, 2)))
    return jnp.transpose(outs, (1, 0, 2))


if __name__ == "__main__":
    # small shapes consistent with the module
    B, T = 2, 8
    embed_size, hidden_size, vocab_size = 32, 32, 128
    E, H, V = embed_size, hidden_size, vocab_size

    key = jax.random.PRNGKey(0)
    ks = jax.random.split(key, 8)
    params = {
        "embedding": jax.random.normal(ks[0], (V, E), jnp.float32) * 0.1,
        "w_ih": jax.random.normal(ks[1], (E, 4 * H), jnp.float32) * 0.1,
        "w_hh": jax.random.normal(ks[2], (H, 4 * H), jnp.float32) * 0.1,
        "b": jax.random.normal(ks[3], (1, 4 * H), jnp.float32) * 0.1,
        "w_out": jax.random.normal(ks[4], (H, V), jnp.float32) * 0.1,
        "b_out": jax.random.normal(ks[5], (1, V), jnp.float32) * 0.1,
    }
    features = jax.random.normal(ks[6], (B, E), jnp.float32)
    captions = jax.random.randint(ks[7], (B, T), 0, V, dtype=jnp.int32)

    out = jax.block_until_ready(caption_generator_forward(features, captions, params))
    ref = _reference_forward(features, captions, params)

    assert out.shape == (B, T + 1, V), out.shape
    # bf16 matmul operands (f32 accumulation) vs the all-f32 reference -> loosened tolerance.
    max_err = float(jnp.max(jnp.abs(out - ref)))
    assert max_err < 3e-2, max_err

    print("KERNEL_OK")
</pallas_src>

<mosaic_0001>
module attributes {stable_mosaic.version = 11 : i64} {
  func.func @_gate_proj_kernel(%arg0: i32, %arg1: memref<72x32xbf16, #tpu.memory_space<vmem>>, %arg2: memref<32x128xbf16, #tpu.memory_space<vmem>>, %arg3: memref<1x128xf32, #tpu.memory_space<vmem>>, %arg4: memref<72x128xf32, #tpu.memory_space<vmem>>) attributes {dimension_semantics = [#tpu.dimension_semantics<parallel>], iteration_bounds = array<i64: 1>, scalar_prefetch = 0 : i64, scratch_operands = 0 : i64, tpu.core_type = #tpu.core_type<tc>, window_params = [{transform_indices = @transform_0, window_bounds = array<i64: 72, 32>}, {pipeline_mode = #tpu.pipeline_mode<synchronous>, transform_indices = @transform_1, window_bounds = array<i64: 32, 128>}, {pipeline_mode = #tpu.pipeline_mode<synchronous>, transform_indices = @transform_2, window_bounds = array<i64: 1, 128>}, {transform_indices = @transform_3, window_bounds = array<i64: 72, 128>}]} {
    %c0 = arith.constant 0 : index
    %c0_0 = arith.constant 0 : index
    %0 = vector.load %arg1[%c0, %c0_0] : memref<72x32xbf16, #tpu.memory_space<vmem>>, vector<72x32xbf16>
    %c0_1 = arith.constant 0 : index
    %c0_2 = arith.constant 0 : index
    %1 = vector.load %arg2[%c0_1, %c0_2] : memref<32x128xbf16, #tpu.memory_space<vmem>>, vector<32x128xbf16>
    %cst = arith.constant dense<0.000000e+00> : vector<72x128xf32>
    %2 = tpu.matmul %0, %1, %cst {dimension_numbers = #tpu.dot_dimension_numbers<[1], [0], [0], [1], [0, 0, 1, 1], [], []>} : vector<72x32xbf16>, vector<32x128xbf16>, vector<72x128xf32> -> vector<72x128xf32>
    %c0_3 = arith.constant 0 : index
    %c0_4 = arith.constant 0 : index
    %3 = vector.load %arg3[%c0_3, %c0_4] : memref<1x128xf32, #tpu.memory_space<vmem>>, vector<1x128xf32>
    %4 = vector.broadcast %3 : vector<1x128xf32> to vector<72x128xf32>
    %5 = arith.addf %2, %4 : vector<72x128xf32>
    %c0_5 = arith.constant 0 : index
    %c0_6 = arith.constant 0 : index
    %6 = vector.load %arg4[%c0_5, %c0_6] : memref<72x128xf32, #tpu.memory_space<vmem>>, vector<72x128xf32>
    tpu.vector_store %arg4[%c0_5, %c0_6], %5 {strides = array<i32>} : memref<72x128xf32, #tpu.memory_space<vmem>>, vector<72x128xf32>,
    return
  }
  func.func @transform_0(%arg0: i32) -> (i32, i32) {
    %c0_i32 = arith.constant 0 : i32
    %c0_i32_0 = arith.constant 0 : i32
    return %arg0, %c0_i32 : i32, i32
  }
  func.func @transform_1(%arg0: i32) -> (i32, i32) {
    %c0_i32 = arith.constant 0 : i32
    %c0_i32_0 = arith.constant 0 : i32
    %c0_i32_1 = arith.constant 0 : i32
    return %c0_i32, %c0_i32_0 : i32, i32
  }
  func.func @transform_2(%arg0: i32) -> (i32, i32) {
    %c0_i32 = arith.constant 0 : i32
    %c0_i32_0 = arith.constant 0 : i32
    %c0_i32_1 = arith.constant 0 : i32
    return %c0_i32, %c0_i32_0 : i32, i32
  }
  func.func @transform_3(%arg0: i32) -> (i32, i32) {
    %c0_i32 = arith.constant 0 : i32
    %c0_i32_0 = arith.constant 0 : i32
    return %arg0, %c0_i32 : i32, i32
  }
}

</mosaic_0001>

<bundles_post_ra>
// kernel: tpu_custom_call.1
= control target key start
LH: loop header
LB: loop body
LE: loop exit
PB: predicated region body
PF: predicated region fallthrough
CT: control target
= control target key end

     0   :  { %v268_v1 = vmov 0.0   ;;  %vm269_vm0 = vmmov 0   ;;  %vm71_vm1 = vcmask 261120   ;;  %s334_s0 = inlined_call_operand.vmem [shape: bf16[72,32], index: 0, kind: input, shape index: {}]   ;;  %s335_s1 = inlined_call_operand.vmem [shape: bf16[32,128], index: 1, kind: input, shape index: {}]   ;;  %s336_s2 = inlined_call_operand.vmem [shape: f32[1,128], index: 2, kind: input, shape index: {}]   ;;  %s337_s3 = inlined_call_operand.hbm [shape: f32[72,128], index: 3, kind: output, shape index: {}]  }
   0x1   :  { %v237_v0 = vld [vmem:[%s335_s1] sm:$0xff]   ;;  %204 = vmatprep.subr.bf16.mxu0 %v268_v1  ;;  %228 = vmatprep.subr.bf16.mxu1 %v268_v1  ;;  %v238_v2 = vld [vmem:[%s335_s1 + $0x8] sm:$0xff]   ;;  %v240_v4 = vld [vmem:[%s334_s0 + $0x18] sm:$0xff]  }
   0x2   :  { %205 = vmatpush3.bf16.msra.mxu0 %v237_v0  ;;  %208 = vmatprep.mubr.msk.bf16.mxu0 %vm269_vm0, %v268_v1  ;;  %v239_v3 = vld [vmem:[%s334_s0] sm:$0xff]  }
   0x3   :  { %206 = vmatprep.subr.bf16.mxu0 %v268_v1  ;;  %230 = vmatpush3.bf16.msra.mxu1 %v237_v0 }
   0x4   :  { %229 = vmatprep.subr.bf16.mxu1 %v268_v1  ;;  %220 = vmatprep.mubr.msk.bf16.mxu1 %vm269_vm0, %v268_v1 }
   0x6   :  { %207 = vmatpush3.bf16.msra.mxu0 %v238_v2 }
   0x7   :  { %231 = vmatpush3.bf16.msra.mxu1 %v238_v2 }
   0x8   :  { %8 = vsyncpa [#allocation3], 0  ;;  %v241_v5 = vld [vmem:[%s334_s0 + $0x8] sm:$0xff]   ;;  %v242_v6 = vld [vmem:[%s334_s0 + $0x20] ss:$0 sps:$4 sm:$0xff]  }
   0x9   :  { %209 = vmatmul.mubr.msk.bf16.vlgmr.msra.gmra.mrb[0].mxu0 %vm71_vm1, %v239_v3  ;;  %v243_v7 = vld [vmem:[%s334_s0 + $0x10] sm:$0xff]   ;;  %v184_v8 = vld [vmem:[%s336_s2] ss:$0 sm:$0xff]  ;;  %s270_s0 = smov [#allocation2]  }
   0xa   :  { %212 = vmatprep.mubr.msk.bf16.mxu0 %vm269_vm0, %v268_v1  ;;  %221 = vmatmul.mubr.msk.bf16.vlgmr.msra.gmra.mrb[0].mxu1 %vm71_vm1, %v240_v4  ;;  %s173_s2 = sshll.u32 %s270_s0, 4  ;;  %s174_s2 = int_to_ptr.vmem [resolvable:$true] %s173_s2 }
   0xb   :  { %224 = vmatprep.mubr.msk.bf16.mxu1 %vm269_vm0, %v268_v1  ;;  %s244_s27 = scalar_lea.vmem %s174_s2, 1152  ;;  %p249_p1 = scmp.lt.s32.totalorder %s174_s2, %s174_s2 }
   0xc   :  { %p245_p0 = scmp.ne.s32.totalorder %s174_s2, %s244_s27  ;;  %p250_p2 = scmp.lt.s32.totalorder %s244_s27, %s244_s27 }
   0xe   :  { %p251_p3 = por %p250_p2, %p249_p1 }
  0x10   :  { %p252_p4 = pnand %p251_p3, %p245_p0 }
  0x11   :  { %213 = vmatmul.mubr.msk.bf16.gmra.mrb[4].mxu0 %vm71_vm1, %v241_v5 }
  0x12   :  { %216 = vmatprep.mubr.msk.bf16.mxu0 %vm269_vm0, %v268_v1  ;;  %225 = vmatmul.mubr.msk.bf16.gmra.mrb[4].mxu1 %vm71_vm1, %v242_v6 }
  0x19   :  { %217 = vmatmul.mubr.msk.bf16.gmra.mrb[8].mxu0 %vm71_vm1, %v243_v7 }
  0xdc   :  { %v121_v9 = vpop.f32.mrb[0].mxu0 }
  0xdd   :  { %v122_v10 = vadd.f32 %v184_v8, %v121_v9  ;;  %v210_v11 = vpop.f32.mrb[1].mxu0  ;;  %v145_v12 = vpop.f32.mrb[0].mxu1 }
  0xde   :  { %v124_v13 = vpop.f32.mrb[2].mxu0  ;;  %v146_v14 = vadd.f32 %v184_v8, %v145_v12  ;;  %v222_v15 = vpop.f32.mrb[1].mxu1 }
  0xdf   :  { %159 = vst [vmem:[#allocation2] sm:$0xff] %v122_v10  ;;  %v125_v16 = vadd.f32 %v184_v8, %v124_v13  ;;  %v211_v17 = vpop.f32.mrb[3].mxu0  ;;  %v148_v18 = vpop.f32.mrb[2].mxu1 }
  0xe0   :  { %165 = vst [vmem:[#allocation2 + $0x30] sm:$0xff] %v146_v14  ;;  %v149_v19 = vadd.f32 %v184_v8, %v148_v18  ;;  %v223_v20 = vpop.f32.mrb[3].mxu1 }
  0xe1   :  { %160 = vst [vmem:[#allocation2 + $0x8] sm:$0xff] %v125_v16 }
  0xe2   :  { %166 = vst [vmem:[#allocation2 + $0x38] sm:$0xff] %v149_v19 }
  0xe4   :  { %v129_v21 = vpop.f32.mrb[4].mxu0 }
  0xe5   :  { %v130_v22 = vadd.f32 %v184_v8, %v129_v21  ;;  %v214_v23 = vpop.f32.mrb[5].mxu0  ;;  %v153_v24 = vpop.f32.mrb[4].mxu1 }
  0xe6   :  { %v132_v25 = vpop.f32.mrb[6].mxu0  ;;  %v154_v26 = vadd.f32 %v184_v8, %v153_v24  ;;  %v226_v27 = vpop.f32.mrb[5].mxu1 }
  0xe7   :  { %161 = vst [vmem:[#allocation2 + $0x10] sm:$0xff] %v130_v22  ;;  %v133_v28 = vadd.f32 %v184_v8, %v132_v25  ;;  %v215_v29 = vpop.f32.mrb[7].mxu0  ;;  %v156_v30 = vpop.f32.mrb[6].mxu1 }
  0xe8   :  { %167 = vst [vmem:[#allocation2 + $0x40] sm:$0xff] %v154_v26  ;;  %v227_v31 = vpop.f32.mrb[7].mxu1 }
  0xe9   :  { %162 = vst [vmem:[#allocation2 + $0x18] sm:$0xff] %v133_v28 }
  0xec   :  { %v137_v32 = vpop.f32.mrb[8].mxu0 }
  0xed   :  { %v138_v33 = vadd.f32 %v184_v8, %v137_v32  ;;  %v218_v34 = vpop.f32.mrb[9].mxu0 }
  0xee   :  { %v140_v35 = vpop.f32.mrb[10].mxu0 }
  0xef   :  { %163 = vst [vmem:[#allocation2 + $0x20] sm:$0xff] %v138_v33  ;;  %v141_v36 = vadd.f32 %v184_v8, %v140_v35  ;;  %v219_v37 = vpop.f32.mrb[11].mxu0 }
  0xf1   :  { %164 = vst [vmem:[#allocation2 + $0x28] sm:$0xff] %v141_v36 }
  0xf2   :  { %255 = shalt.err (!%p252_p4)
}
  0xf3   :  { %s256_s30 = scalar_lea.hbm %s337_s3, 1152 }
  0xf4   :  { %p257_p5 = scmp.ne.s32.totalorder %s337_s3, %s256_s30  ;;  %p260_p6 = scmp.lt.u32.totalorder %s256_s30, %s337_s3 }
  0xf6   :  { %p262_p7 = pnand %p260_p6, %p257_p5 }
  0xf8   :  { %265 = shalt.err (!%p262_p7)
}
  0xf9   :  { %s271_s8 = smov 128   ;;  %s272_s9 = smov 8  }
  0xfa   :  { %179 = dma.vmem_to_hbm [thread:$0]  %s174_s2, 1152, %s337_s3, [#allocation3], %s271_s8, %s271_s8, %s272_s9  }
  0xfb   :  { %266 = dma.done.wait [#allocation3], 1152  }
  0xfc   :  { %267 = vsyncadd [#allocation3], 4294966144 }
  0xfd   :  { %183 = vsyncpa [#allocation3], 1 }

</bundles_post_ra>
